<compile_context>
chip_gen: v7x
topology: tpu7x:2x2x1
jax: 0.10.0
libtpu: 0.0.40
codegen_flags: <defaults>
</compile_context>

<pallas_src>
import jax
import jax.numpy as jnp
from jax.experimental import pallas as pl
from jax.experimental.pallas import tpu as pltpu


def _dma_copy_kernel(x_hbm, o_hbm, sem):
    # Whole-array HBM -> HBM DMA: no VMEM staging, no vld/vst bundle work.
    cp = pltpu.make_async_copy(x_hbm, o_hbm, sem)
    cp.start()
    cp.wait()


def _pallas_contiguous_copy(x):
    """Materializing contiguous copy of `x` (same shape/dtype) via HBM->HBM DMA."""
    nbytes = int(x.size) * jnp.dtype(x.dtype).itemsize
    return pl.pallas_call(
        _dma_copy_kernel,
        out_shape=jax.ShapeDtypeStruct(x.shape, x.dtype),
        in_specs=[pl.BlockSpec(memory_space=pl.ANY)],
        out_specs=pl.BlockSpec(memory_space=pl.ANY),
        scratch_shapes=[pltpu.SemaphoreType.DMA(())],
        cost_estimate=pl.CostEstimate(
            flops=0, transcendentals=0, bytes_accessed=2 * nbytes
        ),
    )(x)


class Reshape:
    """JAX/Pallas equivalent of the PyTorch `reshape` module.

    Default path is metadata-only (`jnp.reshape`), which is the fastest
    implementation on v5e / v6e / v7x — no kernel is launched.  Pass
    materialize=True to force an explicit contiguous copy through the
    Pallas HBM->HBM DMA kernel (bit-identical result).
    """

    def __init__(self, *shape):
        self.shape = shape

    def __call__(self, x, materialize=False):
        if not materialize or x.size == 0:
            # reshape of a contiguous buffer is pure metadata in JAX/XLA.
            return jnp.reshape(x, self.shape)
        # Explicitly requested materializing copy (the ".contiguous()" half),
        # then a metadata-only view of the copied buffer.
        copied = _pallas_contiguous_copy(x)
        return jnp.reshape(copied, self.shape)


if __name__ == "__main__":
    key = jax.random.PRNGKey(0)

    # NCHW feature map with spatial dims flattened: (2, 4, 16, 16) -> (2, 4, 256)
    x = jax.random.normal(key, (2, 4, 16, 16), dtype=jnp.float32)
    mod = Reshape(2, 4, 256)

    # Default (fast) path: metadata-only reshape.
    y = jax.block_until_ready(mod(x))
    ref = jnp.reshape(x, (2, 4, 256))
    assert y.shape == (2, 4, 256)
    assert y.dtype == x.dtype
    assert bool(jnp.all(y == ref))

    # Pallas HBM->HBM DMA copy path (run the kernel once, verify bit-identity).
    y_copy = jax.block_until_ready(mod(x, materialize=True))
    assert y_copy.shape == (2, 4, 256)
    assert y_copy.dtype == x.dtype
    assert bool(jnp.all(y_copy == ref))

    # bf16 case through the kernel as well.
    xb = jax.random.normal(key, (2, 8, 32, 32), dtype=jnp.bfloat16)
    yb = jax.block_until_ready(Reshape(2, 8, 1024)(xb, materialize=True))
    assert bool(jnp.all(yb == jnp.reshape(xb, (2, 8, 1024))))

    print("KERNEL_OK")
</pallas_src>

<mosaic_0001>
module attributes {stable_mosaic.version = 11 : i64} {
  func.func @_dma_copy_kernel(%arg0: memref<2x4x16x16xf32, #tpu.memory_space<any>>, %arg1: memref<2x4x16x16xf32, #tpu.memory_space<any>>, %arg2: memref<!tpu.dma_semaphore, #tpu.memory_space<semaphore_mem>>) attributes {dimension_semantics = [], scalar_prefetch = 0 : i64, scratch_operands = 1 : i64, tpu.core_type = #tpu.core_type<tc>} {
    tpu.enqueue_dma source(%arg0 : memref<2x4x16x16xf32, #tpu.memory_space<any>>) target(%arg1 : memref<2x4x16x16xf32, #tpu.memory_space<any>>) target_semaphore(%arg2 : memref<!tpu.dma_semaphore, #tpu.memory_space<semaphore_mem>>)
    tpu.wait_dma2 semaphore(%arg2 : memref<!tpu.dma_semaphore, #tpu.memory_space<semaphore_mem>>) src(%arg0 : memref<2x4x16x16xf32, #tpu.memory_space<any>>) dst(%arg1 : memref<2x4x16x16xf32, #tpu.memory_space<any>>)
    return
  }
}

</mosaic_0001>

<bundles_post_ra>
// kernel: tpu_custom_call.1
= control target key start
LH: loop header
LB: loop body
LE: loop exit
PB: predicated region body
PF: predicated region fallthrough
CT: control target
= control target key end

     0   :  { %s36_s6 = smov [#allocation2]   ;;  %s37_s7 = smov [#allocation3]   ;;  %s55_s0 = inlined_call_operand.hbm [shape: f32[2,4,16,16], index: 0, kind: input, shape index: {}]   ;;  %s56_s1 = inlined_call_operand.hbm [shape: f32[2,4,16,16], index: 1, kind: output, shape index: {}]  }
   0x1   :  { %s38_s8 = smov 0  }
   0x2   :  { %18 = dma.general %s55_s0, 2048, %s56_s1, %s36_s6, %s37_s7, [#allocation4], %s38_s8, 0  }
   0x3   :  { %34 = dma.done.wait [#allocation2], 2048 }
   0x4   :  { %35 = vsyncadd [#allocation2], 4294965248 }
   0x5   :  { %24 = vsyncmov [#allocation2] }
   0x8   :  { %s25_s13 = vpop.sfrf %24 }
   0x9   :  { %p30_p0 = scmp.ne.s32.totalorder %s25_s13, 0 }
   0xb   :  { %29 = shalt.err (%p30_p0)  }

</bundles_post_ra>
